<compile_context>
chip_gen: v6e
topology: v6e:2x2x1
jax: 0.10.0
libtpu: 0.0.40
codegen_flags: <defaults>
</compile_context>

<pallas_src>
import jax
import jax.numpy as jnp
from jax.experimental import pallas as pl
from jax.experimental.pallas import tpu as pltpu

B = 8          # batch_size
B_TILE = 8     # rows per batch-group grid block (== B here)
F_IN = 128     # raw RSSI feature dim (sdae input)
H1 = 128       # sdae hidden dim
F_S = 64       # sdae output dim; RNN input size = F_S + 1
H = 128        # rnn hidden_size (num_layers = 1)
N_FLOOR = 5    # fnn_floor classes
N_COORD = 2    # fnn_coord outputs (x, y)

LANE = 128
NEG_INF = -1e30

# column blocks of the packed weight tile (128, 6*128), bf16, stored (in, out)
C_W1, C_W2, C_WIH, C_WHH, C_WF, C_WC = range(6)
# rows of the packed vector tile (8, 128), f32
B1_, B2_, BRNN_, WIHE_, BF_, BC_ = range(6)


def simo_rnn_fnn_kernel(x_ref, h0_ref, w_ref, v_ref, out_ref, h_scr):
    f32, bf16 = jnp.float32, jnp.bfloat16
    t = pl.program_id(1)

    # hidden-state carry lives in VMEM scratch; (re)initialize per batch group
    @pl.when(t == 0)
    def _():
        h_scr[...] = h0_ref[...]

    v = v_ref[...]                            # (8, 128) f32
    b1 = v[B1_:B1_ + 1, :]
    b2 = v[B2_:B2_ + 1, :]
    b_rnn = v[BRNN_:BRNN_ + 1, :]             # bih + bhh pre-folded on host
    wih_e = v[WIHE_:WIHE_ + 1, :]             # extra-column RNN input weight
    bfp = v[BF_:BF_ + 1, :]                   # floor bias, pad lanes = -1e30
    bcp = v[BC_:BC_ + 1, :]

    x = x_ref[0]                              # (B_TILE, F_IN) already bf16
    h_prev = h_scr[...]                       # (B_TILE, H) f32

    # ---- SDAE encoder: Linear -> ReLU -> Linear -> ReLU -------------------
    a1 = jnp.maximum(
        jnp.dot(x, w_ref[:, C_W1 * LANE:(C_W1 + 1) * LANE],
                preferred_element_type=f32) + b1, 0.0)
    s = jnp.maximum(
        jnp.dot(a1.astype(bf16), w_ref[:, C_W2 * LANE:(C_W2 + 1) * LANE],
                preferred_element_type=f32) + b2, 0.0)
    s_bf = s.astype(bf16)                     # lanes >= F_S are exactly 0

    # ---- shared input projection, reused by both RNN steps ----------------
    s_ih = jnp.dot(s_bf, w_ref[:, C_WIH * LANE:(C_WIH + 1) * LANE],
                   preferred_element_type=f32) + b_rnn

    # ---- RNN step 1: input = cat(s, 0) -> extra column contributes 0 ------
    h1 = jnp.tanh(s_ih + jnp.dot(h_prev.astype(bf16),
                                 w_ref[:, C_WHH * LANE:(C_WHH + 1) * LANE],
                                 preferred_element_type=f32))
    h1_bf = h1.astype(bf16)

    # ---- merged shared-LHS matmul: h1 @ [W_HH | W_F] (N = 256) ------------
    hh_f = jnp.dot(h1_bf, w_ref[:, C_WHH * LANE:(C_WF + 1) * LANE],
                   preferred_element_type=f32)          # (B_TILE, 256)
    rec2 = hh_f[:, 0:LANE]                              # h1 @ W_HH
    floor_logits = hh_f[:, LANE:2 * LANE] + bfp         # h1 @ W_F + b_f

    # first-occurrence argmax over lanes (padded lanes carry -1e30 bias)
    nb, nf = floor_logits.shape
    col = jax.lax.broadcasted_iota(jnp.int32, (nb, nf), 1)
    mx = jnp.max(floor_logits, axis=1, keepdims=True)
    idx = jnp.min(jnp.where(floor_logits == mx, col, nf), axis=1, keepdims=True)
    extra = idx.astype(f32)                              # (B_TILE, 1)

    # ---- RNN step 2: input = cat(s, argmax_floor), hidden = h1 ------------
    h2 = jnp.tanh(s_ih + extra * wih_e + rec2)

    # ---- fnn_coord (padded to 128 lanes) -----------------------------------
    coord = jnp.dot(h2.astype(bf16), w_ref[:, C_WC * LANE:(C_WC + 1) * LANE],
                    preferred_element_type=f32) + bcp

    # carry hidden state to the next time step
    h_scr[...] = h2

    # single lane-dense packed output slab: [floor | coord | h2]
    out_ref[0, :, 0:LANE] = floor_logits
    out_ref[0, :, LANE:2 * LANE] = coord
    out_ref[0, :, 2 * LANE:3 * LANE] = h2


def _cost_estimate(seq_len):
    # 7 effective 128x128 matmul passes per step (the merged one counts as 2)
    flops = 2 * B * LANE * LANE * 7 * seq_len
    bytes_accessed = (seq_len * B * F_IN * 2          # x (bf16)
                      + B * H * 4                     # h0
                      + LANE * 6 * LANE * 2           # packed bf16 weights
                      + 8 * LANE * 4                  # packed f32 vectors
                      + seq_len * B * 3 * LANE * 4)   # packed output
    return pl.CostEstimate(flops=flops,
                           transcendentals=2 * B * H * seq_len,
                           bytes_accessed=bytes_accessed)


def simo_rnn_fnn_seq(xs, hidden, w_all, v_all):
    """Run the SimoRnnFnn forward over a whole trajectory xs: (T, B, F_IN)."""
    seq_len = xs.shape[0]
    assert xs.shape == (seq_len, B, F_IN)
    nb = B // B_TILE
    h0 = hidden[0]                            # PyTorch layout (1, B, H)

    out = pl.pallas_call(
        simo_rnn_fnn_kernel,
        out_shape=jax.ShapeDtypeStruct((seq_len, B, 3 * LANE), jnp.float32),
        grid_spec=pltpu.PrefetchScalarGridSpec(
            num_scalar_prefetch=0,
            grid=(nb, seq_len),
            in_specs=[
                pl.BlockSpec((1, B_TILE, F_IN), lambda b, t: (t, b, 0)),
                pl.BlockSpec((B_TILE, H), lambda b, t: (b, 0)),
                # constant index maps -> weights/vectors stay VMEM-resident
                pl.BlockSpec((LANE, 6 * LANE), lambda b, t: (0, 0)),
                pl.BlockSpec((8, LANE), lambda b, t: (0, 0)),
            ],
            out_specs=pl.BlockSpec((1, B_TILE, 3 * LANE), lambda b, t: (t, b, 0)),
            scratch_shapes=[pltpu.VMEM((B_TILE, H), jnp.float32)],
        ),
        compiler_params=pltpu.CompilerParams(
            dimension_semantics=("parallel", "arbitrary")),
        cost_estimate=_cost_estimate(seq_len),
    )(xs.astype(jnp.bfloat16), h0, w_all, v_all)

    floor_logits = out[:, :, :N_FLOOR]
    coord = out[:, :, LANE:LANE + N_COORD]
    h_out = out[seq_len - 1, :, 2 * LANE:3 * LANE]
    # return hidden in PyTorch (num_layers, B, H) layout
    return floor_logits, coord, h_out[None]


def simo_rnn_fnn_step(x, hidden, w_all, v_all):
    """Original single-call forward: x (B, F_IN), hidden (1, B, H)."""
    fl, cd, h = simo_rnn_fnn_seq(x[None], hidden, w_all, v_all)
    return fl[0], cd[0], h


simo_rnn_fnn_seq_jit = jax.jit(simo_rnn_fnn_seq)
simo_rnn_fnn_step_jit = jax.jit(simo_rnn_fnn_step)


# ---------------------------------------------------------------------------
# Parameter handling
# ---------------------------------------------------------------------------
def init_params(key):
    ks = jax.random.split(key, 16)

    def lin(kw, kb, fan_in, fan_out):
        scale = 1.0 / jnp.sqrt(fan_in)
        w = jax.random.uniform(kw, (fan_in, fan_out), jnp.float32, -scale, scale)
        b = jax.random.uniform(kb, (1, fan_out), jnp.float32, -scale, scale)
        return w, b

    w1, b1 = lin(ks[0], ks[1], F_IN, H1)          # sdae layer 1
    w2, b2 = lin(ks[2], ks[3], H1, F_S)           # sdae layer 2
    wih_full, bih = lin(ks[4], ks[5], F_S + 1, H) # RNN W_ih for input F_S+1
    wih_s = wih_full[:F_S, :]
    wih_e = wih_full[F_S:, :]                     # (1, H): extra-column weights
    whh, bhh = lin(ks[6], ks[7], H, H)            # RNN hidden-hidden
    wf, bf = lin(ks[8], ks[9], H, N_FLOOR)        # fnn_floor
    wc, bc = lin(ks[10], ks[11], H, N_COORD)      # fnn_coord
    return (w1, b1, w2, b2, wih_s, wih_e, bih, whh, bhh, wf, bf, wc, bc)


def pack_params(params):
    (w1, b1, w2, b2, wih_s, wih_e, bih, whh, bhh, wf, bf, wc, bc) = params

    def pad2(a, rows, cols, fill=0.0):
        out = jnp.full((rows, cols), fill, jnp.float32)
        return out.at[:a.shape[0], :a.shape[1]].set(a)

    w2p = pad2(w2, H1, LANE)                 # out cols F_S..127 zero -> relu keeps 0
    wihp = pad2(wih_s, LANE, H)              # zero rows for the padded s lanes
    wfp = pad2(wf, H, LANE)                  # floor head, padded out cols zero
    wcp = pad2(wc, H, LANE)                  # coord head, padded out cols zero
    # Padded floor-head columns must stay exactly zero so the -1e30 pad bias
    # alone guarantees pad lanes never win the argmax.
    assert float(jnp.max(jnp.abs(wfp[:, N_FLOOR:]))) == 0.0

    # column blocks: [W1 | W2 | W_IH | W_HH | W_F | W_C] -> (128, 768) bf16
    # (W_HH and W_F adjacent so the kernel can issue h1 @ [W_HH | W_F] once)
    w_all = jnp.concatenate([w1, w2p, wihp, whh, wfp, wcp],
                            axis=1).astype(jnp.bfloat16)

    v_all = jnp.concatenate([
        b1,
        pad2(b2, 1, LANE),
        bih + bhh,                           # fold the two RNN biases
        wih_e,
        pad2(bf, 1, LANE, fill=NEG_INF),     # padded floor lanes can never win
        pad2(bc, 1, LANE),
        jnp.zeros((2, LANE), jnp.float32),   # pad to a full (8,128) sublane tile
    ], axis=0)                               # (8, 128) f32
    return w_all, v_all


def init_hidden():
    # mirrors SimoRnnFnn.initHidden(): zeros(num_layers, batch_size, hidden)
    return jnp.zeros((1, B, H), jnp.float32)


# ---------------------------------------------------------------------------
# Pure-JAX reference (same bf16 matmul casts) for a correctness check
# ---------------------------------------------------------------------------
def reference_seq(xs, hidden, params):
    (w1, b1, w2, b2, wih_s, wih_e, bih, whh, bhh, wf, bf, wc, bc) = params
    f32, bf16 = jnp.float32, jnp.bfloat16
    dot = lambda a, b: jnp.dot(a.astype(bf16), b.astype(bf16),
                               preferred_element_type=f32)

    def step(h, x):
        a1 = jnp.maximum(dot(x, w1) + b1, 0.0)
        s = jnp.maximum(dot(a1, w2) + b2, 0.0)
        s_ih = dot(s, wih_s) + bih + bhh
        h1 = jnp.tanh(s_ih + dot(h, whh))
        fl = dot(h1, wf) + bf
        idx = jnp.argmax(fl, axis=1).astype(f32)[:, None]
        h2 = jnp.tanh(s_ih + idx * wih_e + dot(h1, whh))
        cd = dot(h2, wc) + bc
        return h2, (fl, cd)

    h_final, (fls, cds) = jax.lax.scan(step, hidden[0], xs)
    return fls, cds, h_final[None]


if __name__ == "__main__":
    T = 8
    key = jax.random.PRNGKey(0)
    k_in, k_par = jax.random.split(key)
    xs = jax.random.normal(k_in, (T, B, F_IN), jnp.float32)
    params = init_params(k_par)
    w_all, v_all = pack_params(params)
    hidden = init_hidden()

    fl, cd, h_out = simo_rnn_fnn_seq_jit(xs, hidden, w_all, v_all)
    jax.block_until_ready((fl, cd, h_out))

    assert fl.shape == (T, B, N_FLOOR)
    assert cd.shape == (T, B, N_COORD)
    assert h_out.shape == (1, B, H)

    fl_r, cd_r, h_r = reference_seq(xs, hidden, params)
    assert jnp.allclose(fl, fl_r, rtol=5e-2, atol=5e-2)
    assert jnp.allclose(cd, cd_r, rtol=5e-2, atol=5e-2)
    assert jnp.allclose(h_out, h_r, rtol=5e-2, atol=5e-2)

    # single-step API (matches the original PyTorch forward signature)
    fl1, cd1, h1 = simo_rnn_fnn_step_jit(xs[0], hidden, w_all, v_all)
    jax.block_until_ready((fl1, cd1, h1))
    assert fl1.shape == (B, N_FLOOR)
    assert cd1.shape == (B, N_COORD)
    assert h1.shape == (1, B, H)
    assert jnp.allclose(fl1, fl_r[0], rtol=5e-2, atol=5e-2)
    assert jnp.allclose(cd1, cd_r[0], rtol=5e-2, atol=5e-2)

    print("KERNEL_OK")
</pallas_src>

<mosaic_0001>
module attributes {stable_mosaic.version = 11 : i64} {
  func.func @simo_rnn_fnn_kernel(%arg0: i32, %arg1: i32, %arg2: memref<1x8x128xbf16, #tpu.memory_space<vmem>>, %arg3: memref<8x128xf32, #tpu.memory_space<vmem>>, %arg4: memref<128x768xbf16, #tpu.memory_space<vmem>>, %arg5: memref<8x128xf32, #tpu.memory_space<vmem>>, %arg6: memref<1x8x384xf32, #tpu.memory_space<vmem>>, %arg7: memref<8x128xf32, #tpu.memory_space<vmem>>) attributes {dimension_semantics = [#tpu.dimension_semantics<parallel>, #tpu.dimension_semantics<arbitrary>], iteration_bounds = array<i64: 1, 8>, scalar_prefetch = 0 : i64, scratch_operands = 1 : i64, tpu.core_type = #tpu.core_type<tc>, window_params = [{transform_indices = @transform_0, window_bounds = array<i64: 1, 8, 128>}, {transform_indices = @transform_1, window_bounds = array<i64: 8, 128>}, {pipeline_mode = #tpu.pipeline_mode<synchronous>, transform_indices = @transform_2, window_bounds = array<i64: 128, 768>}, {pipeline_mode = #tpu.pipeline_mode<synchronous>, transform_indices = @transform_3, window_bounds = array<i64: 8, 128>}, {transform_indices = @transform_4, window_bounds = array<i64: 1, 8, 384>}]} {
    %c0_i32 = arith.constant 0 : i32
    %0 = arith.cmpi eq, %arg1, %c0_i32 : i32
    %1 = arith.extui %0 : i1 to i32
    %c0_i32_0 = arith.constant 0 : i32
    %2 = arith.cmpi ne, %1, %c0_i32_0 : i32
    scf.if %2 {
      %c0_35 = arith.constant 0 : index
      %c0_36 = arith.constant 0 : index
      %74 = vector.load %arg3[%c0_35, %c0_36] : memref<8x128xf32, #tpu.memory_space<vmem>>, vector<8x128xf32>
      %c0_37 = arith.constant 0 : index
      %c0_38 = arith.constant 0 : index
      %75 = vector.load %arg7[%c0_37, %c0_38] : memref<8x128xf32, #tpu.memory_space<vmem>>, vector<8x128xf32>
      tpu.vector_store %arg7[%c0_37, %c0_38], %74 {strides = array<i32>} : memref<8x128xf32, #tpu.memory_space<vmem>>, vector<8x128xf32>,
    } else {
    }
    %c0 = arith.constant 0 : index
    %c0_1 = arith.constant 0 : index
    %3 = vector.load %arg5[%c0, %c0_1] : memref<8x128xf32, #tpu.memory_space<vmem>>, vector<8x128xf32>
    %4 = vector.extract_strided_slice %3 {offsets = [0, 0], sizes = [1, 128], strides = [1, 1]} : vector<8x128xf32> to vector<1x128xf32>
    %5 = vector.extract_strided_slice %3 {offsets = [1, 0], sizes = [1, 128], strides = [1, 1]} : vector<8x128xf32> to vector<1x128xf32>
    %6 = vector.extract_strided_slice %3 {offsets = [2, 0], sizes = [1, 128], strides = [1, 1]} : vector<8x128xf32> to vector<1x128xf32>
    %7 = vector.extract_strided_slice %3 {offsets = [3, 0], sizes = [1, 128], strides = [1, 1]} : vector<8x128xf32> to vector<1x128xf32>
    %8 = vector.extract_strided_slice %3 {offsets = [4, 0], sizes = [1, 128], strides = [1, 1]} : vector<8x128xf32> to vector<1x128xf32>
    %9 = vector.extract_strided_slice %3 {offsets = [5, 0], sizes = [1, 128], strides = [1, 1]} : vector<8x128xf32> to vector<1x128xf32>
    %c0_2 = arith.constant 0 : index
    %c0_3 = arith.constant 0 : index
    %c0_4 = arith.constant 0 : index
    %10 = vector.load %arg2[%c0_2, %c0_3, %c0_4] : memref<1x8x128xbf16, #tpu.memory_space<vmem>>, vector<1x8x128xbf16>
    %11 = vector.shape_cast %10 : vector<1x8x128xbf16> to vector<8x128xbf16>
    %c0_5 = arith.constant 0 : index
    %c0_6 = arith.constant 0 : index
    %12 = vector.load %arg7[%c0_5, %c0_6] : memref<8x128xf32, #tpu.memory_space<vmem>>, vector<8x128xf32>
    %c0_7 = arith.constant 0 : index
    %c0_8 = arith.constant 0 : index
    %13 = vector.load %arg4[%c0_7, %c0_8] : memref<128x768xbf16, #tpu.memory_space<vmem>>, vector<128x128xbf16>
    %cst = arith.constant dense<0.000000e+00> : vector<8x128xf32>
    %14 = tpu.matmul %11, %13, %cst {dimension_numbers = #tpu.dot_dimension_numbers<[1], [0], [0], [1], [0, 0, 1, 1], [], []>} : vector<8x128xbf16>, vector<128x128xbf16>, vector<8x128xf32> -> vector<8x128xf32>
    %15 = vector.broadcast %4 : vector<1x128xf32> to vector<8x128xf32>
    %16 = arith.addf %14, %15 : vector<8x128xf32>
    %cst_9 = arith.constant 0.000000e+00 : f32
    %17 = vector.broadcast %cst_9 : f32 to vector<8x128xf32>
    %18 = arith.maximumf %16, %17 : vector<8x128xf32>
    %19 = arith.truncf %18 : vector<8x128xf32> to vector<8x128xbf16>
    %c0_10 = arith.constant 0 : index
    %c128 = arith.constant 128 : index
    %20 = vector.load %arg4[%c0_10, %c128] : memref<128x768xbf16, #tpu.memory_space<vmem>>, vector<128x128xbf16>
    %cst_11 = arith.constant dense<0.000000e+00> : vector<8x128xf32>
    %21 = tpu.matmul %19, %20, %cst_11 {dimension_numbers = #tpu.dot_dimension_numbers<[1], [0], [0], [1], [0, 0, 1, 1], [], []>} : vector<8x128xbf16>, vector<128x128xbf16>, vector<8x128xf32> -> vector<8x128xf32>
    %22 = vector.broadcast %5 : vector<1x128xf32> to vector<8x128xf32>
    %23 = arith.addf %21, %22 : vector<8x128xf32>
    %cst_12 = arith.constant 0.000000e+00 : f32
    %24 = vector.broadcast %cst_12 : f32 to vector<8x128xf32>
    %25 = arith.maximumf %23, %24 : vector<8x128xf32>
    %26 = arith.truncf %25 : vector<8x128xf32> to vector<8x128xbf16>
    %c0_13 = arith.constant 0 : index
    %c256 = arith.constant 256 : index
    %27 = vector.load %arg4[%c0_13, %c256] : memref<128x768xbf16, #tpu.memory_space<vmem>>, vector<128x128xbf16>
    %cst_14 = arith.constant dense<0.000000e+00> : vector<8x128xf32>
    %28 = tpu.matmul %26, %27, %cst_14 {dimension_numbers = #tpu.dot_dimension_numbers<[1], [0], [0], [1], [0, 0, 1, 1], [], []>} : vector<8x128xbf16>, vector<128x128xbf16>, vector<8x128xf32> -> vector<8x128xf32>
    %29 = vector.broadcast %6 : vector<1x128xf32> to vector<8x128xf32>
    %30 = arith.addf %28, %29 : vector<8x128xf32>
    %31 = arith.truncf %12 : vector<8x128xf32> to vector<8x128xbf16>
    %c0_15 = arith.constant 0 : index
    %c384 = arith.constant 384 : index
    %32 = vector.load %arg4[%c0_15, %c384] : memref<128x768xbf16, #tpu.memory_space<vmem>>, vector<128x128xbf16>
    %cst_16 = arith.constant dense<0.000000e+00> : vector<8x128xf32>
    %33 = tpu.matmul %31, %32, %cst_16 {dimension_numbers = #tpu.dot_dimension_numbers<[1], [0], [0], [1], [0, 0, 1, 1], [], []>} : vector<8x128xbf16>, vector<128x128xbf16>, vector<8x128xf32> -> vector<8x128xf32>
    %34 = arith.addf %30, %33 : vector<8x128xf32>
    %35 = math.tanh %34 : vector<8x128xf32>
    %36 = arith.truncf %35 : vector<8x128xf32> to vector<8x128xbf16>
    %c0_17 = arith.constant 0 : index
    %c384_18 = arith.constant 384 : index
    %37 = vector.load %arg4[%c0_17, %c384_18] : memref<128x768xbf16, #tpu.memory_space<vmem>>, vector<128x256xbf16>
    %cst_19 = arith.constant dense<0.000000e+00> : vector<8x256xf32>
    %38 = tpu.matmul %36, %37, %cst_19 {dimension_numbers = #tpu.dot_dimension_numbers<[1], [0], [0], [1], [0, 0, 1, 1], [], []>} : vector<8x128xbf16>, vector<128x256xbf16>, vector<8x256xf32> -> vector<8x256xf32>
    %39 = vector.extract_strided_slice %38 {offsets = [0, 0], sizes = [8, 128], strides = [1, 1]} : vector<8x256xf32> to vector<8x128xf32>
    %40 = vector.extract_strided_slice %38 {offsets = [0, 128], sizes = [8, 128], strides = [1, 1]} : vector<8x256xf32> to vector<8x128xf32>
    %41 = vector.broadcast %8 : vector<1x128xf32> to vector<8x128xf32>
    %42 = arith.addf %40, %41 : vector<8x128xf32>
    %43 = tpu.iota {dimensions = array<i32: 1>} : vector<8x128xi32>
    %cst_20 = arith.constant dense<0xFF800000> : vector<8xf32>
    %44 = vector.multi_reduction <maximumf>, %42, %cst_20 [1] : vector<8x128xf32> to vector<8xf32>
    %45 = vector.shape_cast %44 : vector<8xf32> to vector<8x1xf32>
    %46 = vector.broadcast %45 : vector<8x1xf32> to vector<8x128xf32>
    %47 = arith.cmpf oeq, %42, %46 : vector<8x128xf32>
    %c128_i32 = arith.constant 128 : i32
    %48 = vector.broadcast %c128_i32 : i32 to vector<8x128xi32>
    %49 = arith.select %47, %43, %48 : vector<8x128xi1>, vector<8x128xi32>
    %cst_21 = arith.constant dense<2147483647> : vector<8xi32>
    %50 = vector.multi_reduction <minsi>, %49, %cst_21 [1] : vector<8x128xi32> to vector<8xi32>
    %51 = vector.shape_cast %50 : vector<8xi32> to vector<8x1xi32>
    %52 = arith.sitofp %51 : vector<8x1xi32> to vector<8x1xf32>
    %53 = vector.broadcast %52 : vector<8x1xf32> to vector<8x128xf32>
    %54 = vector.broadcast %7 : vector<1x128xf32> to vector<8x128xf32>
    %55 = arith.mulf %53, %54 : vector<8x128xf32>
    %56 = arith.addf %30, %55 : vector<8x128xf32>
    %57 = arith.addf %56, %39 : vector<8x128xf32>
    %58 = math.tanh %57 : vector<8x128xf32>
    %59 = arith.truncf %58 : vector<8x128xf32> to vector<8x128xbf16>
    %c0_22 = arith.constant 0 : index
    %c640 = arith.constant 640 : index
    %60 = vector.load %arg4[%c0_22, %c640] : memref<128x768xbf16, #tpu.memory_space<vmem>>, vector<128x128xbf16>
    %cst_23 = arith.constant dense<0.000000e+00> : vector<8x128xf32>
    %61 = tpu.matmul %59, %60, %cst_23 {dimension_numbers = #tpu.dot_dimension_numbers<[1], [0], [0], [1], [0, 0, 1, 1], [], []>} : vector<8x128xbf16>, vector<128x128xbf16>, vector<8x128xf32> -> vector<8x128xf32>
    %62 = vector.broadcast %9 : vector<1x128xf32> to vector<8x128xf32>
    %63 = arith.addf %61, %62 : vector<8x128xf32>
    %c0_24 = arith.constant 0 : index
    %c0_25 = arith.constant 0 : index
    %64 = vector.load %arg7[%c0_24, %c0_25] : memref<8x128xf32, #tpu.memory_space<vmem>>, vector<8x128xf32>
    tpu.vector_store %arg7[%c0_24, %c0_25], %58 {strides = array<i32>} : memref<8x128xf32, #tpu.memory_space<vmem>>, vector<8x128xf32>,
    %c0_26 = arith.constant 0 : index
    %c0_27 = arith.constant 0 : index
    %c0_28 = arith.constant 0 : index
    %65 = vector.load %arg6[%c0_26, %c0_27, %c0_28] : memref<1x8x384xf32, #tpu.memory_space<vmem>>, vector<1x8x128xf32>
    %66 = vector.shape_cast %65 : vector<1x8x128xf32> to vector<8x128xf32>
    %67 = vector.shape_cast %42 : vector<8x128xf32> to vector<1x8x128xf32>
    tpu.vector_store %arg6[%c0_26, %c0_27, %c0_28], %67 {strides = array<i32>} : memref<1x8x384xf32, #tpu.memory_space<vmem>>, vector<1x8x128xf32>,
    %c0_29 = arith.constant 0 : index
    %c0_30 = arith.constant 0 : index
    %c128_31 = arith.constant 128 : index
    %68 = vector.load %arg6[%c0_29, %c0_30, %c128_31] : memref<1x8x384xf32, #tpu.memory_space<vmem>>, vector<1x8x128xf32>
    %69 = vector.shape_cast %68 : vector<1x8x128xf32> to vector<8x128xf32>
    %70 = vector.shape_cast %63 : vector<8x128xf32> to vector<1x8x128xf32>
    tpu.vector_store %arg6[%c0_29, %c0_30, %c128_31], %70 {strides = array<i32>} : memref<1x8x384xf32, #tpu.memory_space<vmem>>, vector<1x8x128xf32>,
    %c0_32 = arith.constant 0 : index
    %c0_33 = arith.constant 0 : index
    %c256_34 = arith.constant 256 : index
    %71 = vector.load %arg6[%c0_32, %c0_33, %c256_34] : memref<1x8x384xf32, #tpu.memory_space<vmem>>, vector<1x8x128xf32>
    %72 = vector.shape_cast %71 : vector<1x8x128xf32> to vector<8x128xf32>
    %73 = vector.shape_cast %58 : vector<8x128xf32> to vector<1x8x128xf32>
    tpu.vector_store %arg6[%c0_32, %c0_33, %c256_34], %73 {strides = array<i32>} : memref<1x8x384xf32, #tpu.memory_space<vmem>>, vector<1x8x128xf32>,
    return
  }
  func.func @transform_0(%arg0: i32, %arg1: i32) -> (i32, i32, i32) {
    %c0_i32 = arith.constant 0 : i32
    %c0_i32_0 = arith.constant 0 : i32
    return %arg1, %arg0, %c0_i32 : i32, i32, i32
  }
  func.func @transform_1(%arg0: i32, %arg1: i32) -> (i32, i32) {
    %c0_i32 = arith.constant 0 : i32
    %c0_i32_0 = arith.constant 0 : i32
    return %arg0, %c0_i32 : i32, i32
  }
  func.func @transform_2(%arg0: i32, %arg1: i32) -> (i32, i32) {
    %c0_i32 = arith.constant 0 : i32
    %c0_i32_0 = arith.constant 0 : i32
    %c0_i32_1 = arith.constant 0 : i32
    return %c0_i32, %c0_i32_0 : i32, i32
  }
  func.func @transform_3(%arg0: i32, %arg1: i32) -> (i32, i32) {
    %c0_i32 = arith.constant 0 : i32
    %c0_i32_0 = arith.constant 0 : i32
    %c0_i32_1 = arith.constant 0 : i32
    return %c0_i32, %c0_i32_0 : i32, i32
  }
  func.func @transform_4(%arg0: i32, %arg1: i32) -> (i32, i32, i32) {
    %c0_i32 = arith.constant 0 : i32
    %c0_i32_0 = arith.constant 0 : i32
    return %arg1, %arg0, %c0_i32 : i32, i32, i32
  }
}

</mosaic_0001>

<bundles_post_ra>
// kernel: simo_rnn_fnn_seq.1
= control target key start
LH: loop header
LB: loop body
LE: loop exit
PB: predicated region body
PF: predicated region fallthrough
CT: control target
= control target key end

     0   :  { %9 = vsyncpa [#allocation4], 0  ;;  %s1512_s15 = smov 0   ;;  %s1514_s16 = smov 0   ;;  %s1658_s0 = inlined_call_operand.vmem [shape: bf16[8,8,128], index: 0, kind: input, shape index: {}]   ;;  %s1659_s1 = inlined_call_operand.vmem [shape: f32[8,128], index: 1, kind: input, shape index: {}]   ;;  %s1660_s2 = inlined_call_operand.hbm [shape: bf16[128,768], index: 2, kind: input, shape index: {}]   ;;  %s1661_s3 = inlined_call_operand.vmem [shape: f32[8,128], index: 3, kind: input, shape index: {}]   ;;  %s1662_s4 = inlined_call_operand.vmem [shape: f32[8,8,384], index: 4, kind: output, shape index: {}]  }
   0x1   :  { %s1516_s17 = smov 0  }
   0x2 LB: > { %s1104_s18 = sadd.s32 4294967295, %s1479_s17   ;;  %s24_s19 = sadd.s32 1, %s1475_s16  ;;  %s1479_s17 = sphi %s1516_s17, %s15_s17   ;;  %s1475_s16 = sphi %s1514_s16, %s1666_s16   ;;  %s1471_s15 = sphi %s1512_s15, %s1665_s15  }
   0x3   : > { %p25_p0 = scmp.ge.s32.totalorder %s24_s19, 8  ;;  %p1106_p1 = scmp.ge.s32.totalorder %s1479_s17, 1 }
   0x4   : > { %p156_p2 = scmp.lt.s32.totalorder %s1479_s17, 9  ;;  %p1537_p4 = scmp.eq.s32.totalorder %s1104_s18, 0 }
   0x5   : > { %s1668_s19 = smov (%p25_p0, %s24_s19), 0  ;;  %s1481_s22 = smov [#allocation3]  }
   0x6   : > { %p1533_p3 = pnand %p1106_p1, %p156_p2  ;;  %s175_s23 = sshll.u32 %s1481_s22, 4  ;;  %s176_s23 = int_to_ptr.vmem [resolvable:$true] %s175_s23 }
   0x7   : > { %s1438_s24 = scalar_lea.vmem %s176_s23, 6144  ;;  %p1446_p11 = scmp.lt.s32.totalorder %s176_s23, %s176_s23 }
   0x8   : > { %p1323_p5 = pneg %p1533_p3  ;;  %p1439_p8 = scmp.ne.s32.totalorder %s176_s23, %s1438_s24 }
   0x9   : > { %p1447_p12 = scmp.lt.s32.totalorder %s1438_s24, %s1438_s24 }
   0xa   : > { %p1324_p6 = pnand %p1537_p4, %p1323_p5 }
   0xb   : > { %p1448_p13 = por %p1447_p12, %p1446_p11 }
   0xc   : > { %p1429_p7 = pneg %p1324_p6 }
   0xe   : > { %p1441_p9 = pnand %p1439_p8, %p1429_p7 }
  0x10   : > { %p1442_p10 = pneg %p1441_p9 }
  0x12   : > { %p1449_p0 = pnand %p1448_p13, %p1442_p10 }
  0x14   : > { %1452 = shalt.err (!%p1449_p0)
}
  0x15   : > { %s1482_s25 = smov 384   ;;  %s1483_s26 = smov 24  }
  0x16   : > { %1326 = dma.hbm_to_vmem [thread:$0]  (!%p1324_p6), %s1660_s2, 6144, %s176_s23, [#allocation4], %s1482_s25, %s1482_s25, %s1483_s26  }
  0x17   : > { %204 = sbr.rel (%p1533_p3) target bundleno = 1530 (0x5fa), region = 36 }
  0x1c   : > { %1466 = dma.done.wait (%p1537_p4), [#allocation4], 6144  }
  0x1d   : > { %1468 = vsyncadd (%p1537_p4), [#allocation4], 4294961152  ;;  %p240_p1 = scmp.lt.s32.totalorder %s1471_s15, 7  ;;  %p1114_p2 = scmp.ne.s32.totalorder %s1471_s15, 0 }
  0x1f   : > { %s241_s29 = scalar_select %p240_p1, %s1471_s15, 7 }
  0x20   : > { %264 = sbr.rel (%p1114_p2) target bundleno = 39 (0x27), region = 44 }
  0x21   : > { %s1112_s30 = sshll.u32 %s241_s29, 2  ;;  %s1318_s5 = smul.u32 24, %s241_s29 }
  0x22   : > { %s1559_s8 = scalar_lea.vmem %s1658_s0, %s1112_s30 }
  0x23   : > { %s1564_s11 = scalar_lea.vmem %s1662_s4, %s1318_s5 }
  0x25   : > { %v265_v0 = vld [vmem:[%s1659_s1] sm:$0xff] }
  0x26   : > { %266 = vst [vmem:[#allocation2] sm:$0xff] %v265_v0 }
  0x27 PF: > { %v1484_v1 = vmov 0.0   ;;  %v1359_v2 = vld [vmem:[#allocation3 + $0x150] ss:$24 sps:$4 sm:$0xff]   ;;  %vm1485_vm0 = vmmov 0   ;;  %v1360_v3 = vld [vmem:[#allocation3 + $0x120] ss:$24 sps:$4 sm:$0xff]   ;;  %v286_v25 = vlaneseq }
  0x28   : > { %1218 = vmatprep.subr.bf16.mxu0 %v1484_v1  ;;  %1234 = vmatprep.mubr.msk.bf16.mxu0 %vm1485_vm0, %v1484_v1  ;;  %v1361_v4 = vld [vmem:[#allocation3 + $0xf0] ss:$24 sps:$4 sm:$0xff]   ;;  %v1367_v5 = vld [vmem:[#allocation3 + $0x154] ss:$24 sps:$4 sm:$0xff]   ;;  %v1362_v6 = vld [vmem:[#allocation3 + $0xc0] ss:$24 sps:$4 sm:$0xff]  }
  0x29   : > { %1238 = vmatprep.subr.bf16.mxu1 %v1484_v1  ;;  %1254 = vmatprep.mubr.msk.bf16.mxu1 %vm1485_vm0, %v1484_v1  ;;  %v1368_v7 = vld [vmem:[#allocation3 + $0x124] ss:$24 sps:$4 sm:$0xff]   ;;  %v1363_v8 = vld [vmem:[#allocation3 + $0x90] ss:$24 sps:$4 sm:$0xff]   ;;  %v1369_v9 = vld [vmem:[#allocation3 + $0xf4] ss:$24 sps:$4 sm:$0xff]  }
  0x2a   : > { %1219 = vmatpush3.bf16.msra.mxu0 %v1359_v2  ;;  %1239 = vmatpush3.bf16.msra.mxu1 %v1367_v5  ;;  %v1364_v10 = vld [vmem:[#allocation3 + $0x60] ss:$24 sps:$4 sm:$0xff]   ;;  %v1370_v11 = vld [vmem:[#allocation3 + $0xc4] ss:$24 sps:$4 sm:$0xff]   ;;  %v1365_v12 = vld [vmem:[#allocation3 + $0x30] ss:$24 sps:$4 sm:$0xff]  }
  0x2b   : > { %1220 = vmatprep.subr.bf16.mxu0 %v1484_v1  ;;  %1240 = vmatprep.subr.bf16.mxu1 %v1484_v1  ;;  %v1371_v13 = vld [vmem:[#allocation3 + $0x94] ss:$24 sps:$4 sm:$0xff]   ;;  %v1366_v14 = vld [vmem:[#allocation3] ss:$24 sps:$4 sm:$0xff]   ;;  %v1372_v15 = vld [vmem:[#allocation3 + $0x64] ss:$24 sps:$4 sm:$0xff]  }
  0x2c   : > { %v268_v16 = vld [vmem:[%s1559_s8] sm:$0xf]  ;;  %v1373_v17 = vld [vmem:[#allocation3 + $0x34] ss:$24 sps:$4 sm:$0xff]   ;;  %v1374_v18 = vld [vmem:[#allocation3 + $0x4] ss:$24 sps:$4 sm:$0xff]  }
  0x2d   : > { %v1376_v19 = vld [vmem:[#allocation3 + $0x158] ss:$24 sps:$4 sm:$0xff]   ;;  %v1378_v20 = vld [vmem:[#allocation3 + $0x128] ss:$24 sps:$4 sm:$0xff]   ;;  %v1602_v26 = vshrl.u32 %v286_v25, 7 }
  0x2e   : > { %1221 = vmatpush3.bf16.msra.mxu0 %v1360_v3  ;;  %1241 = vmatpush3.bf16.msra.mxu1 %v1368_v7  ;;  %v1380_v21 = vld [vmem:[#allocation3 + $0xf8] ss:$24 sps:$4 sm:$0xff]   ;;  %v1382_v22 = vld [vmem:[#allocation3 + $0xc8] ss:$24 sps:$4 sm:$0xff]   ;;  %v1375_v35 = vld [vmem:[#allocation3 + $0x15c] ss:$24 sps:$4 sm:$0xff]  }
  0x2f   : > { %1222 = vmatprep.subr.bf16.mxu0 %v1484_v1  ;;  %1242 = vmatprep.subr.bf16.mxu1 %v1484_v1  ;;  %v1384_v23 = vld [vmem:[#allocation3 + $0x98] ss:$24 sps:$4 sm:$0xff]   ;;  %v1386_v24 = vld [vmem:[#allocation3 + $0x68] ss:$24 sps:$4 sm:$0xff]   ;;  %v288_v27 = vsub.s32 0, %v1602_v26  ;;  %v398_v50 = vsub.s32 1, %v1602_v26 }
  0x30   : > { %v1608_v28 = vld [vmem:[%s1661_s3] sm:$0xff]  ;;  %v1377_v38 = vld [vmem:[#allocation3 + $0x12c] ss:$24 sps:$4 sm:$0xff]   ;;  %v1390_v48 = vld [vmem:[#allocation3 + $0x8] ss:$24 sps:$4 sm:$0xff]  }
  0x31   : > { %v289_v29 = vrot.slane %v1608_v28, %v288_v27  ;;  %v1379_v39 = vld [vmem:[#allocation3 + $0xfc] ss:$24 sps:$4 sm:$0xff]   ;;  %v1381_v40 = vld [vmem:[#allocation3 + $0xcc] ss:$24 sps:$4 sm:$0xff]   ;;  %v1388_v44 = vld [vmem:[#allocation3 + $0x38] ss:$24 sps:$4 sm:$0xff]   ;;  %v399_v51 = vrot.slane %v1608_v28, %v398_v50 }
  0x32   : > { %1223 = vmatpush3.bf16.msra.mxu0 %v1361_v4  ;;  %1243 = vmatpush3.bf16.msra.mxu1 %v1369_v9  ;;  %v1383_v41 = vld [vmem:[#allocation3 + $0x9c] ss:$24 sps:$4 sm:$0xff]   ;;  %v1385_v42 = vld [vmem:[#allocation3 + $0x6c] ss:$24 sps:$4 sm:$0xff]   ;;  %v1393_v49 = vld [vmem:[#allocation3 + $0x160] ss:$24 sps:$4 sm:$0xff]  }
  0x33   : > { %1224 = vmatprep.subr.bf16.mxu0 %v1484_v1  ;;  %1244 = vmatprep.subr.bf16.mxu1 %v1484_v1  ;;  %v1387_v43 = vld [vmem:[#allocation3 + $0x3c] ss:$24 sps:$4 sm:$0xff]   ;;  %v1389_v45 = vld [vmem:[#allocation3 + $0xc] ss:$24 sps:$4 sm:$0xff]   ;;  %v1396_v59 = vld [vmem:[#allocation3 + $0x130] ss:$24 sps:$4 sm:$0xff]  }
  0x34   : > { %v269_v46 = vld [vmem:[#allocation2] sm:$0xff]  ;;  %v1394_v61 = vld [vmem:[#allocation3 + $0x12c] ss:$24 sps:$4 sm:$0xff]   ;;  %v1402_v3 = vld [vmem:[#allocation3 + $0xd0] ss:$24 sps:$4 sm:$0xff]  }
  0x35   : > { %v598_v47 = vpack.c.bf16 %v269_v46, %v269_v46  ;;  %v1391_v57 = vld [vmem:[#allocation3 + $0x15c] ss:$24 sps:$4 sm:$0xff]   ;;  %v1399_v62 = vld [vmem:[#allocation3 + $0x100] ss:$24 sps:$4 sm:$0xff]   ;;  %v1400_v5 = vld [vmem:[#allocation3 + $0xcc] ss:$24 sps:$4 sm:$0xff]  }
  0x36   : > { %1225 = vmatpush3.bf16.msra.mxu0 %v1362_v6  ;;  %1245 = vmatpush3.bf16.msra.mxu1 %v1370_v11  ;;  %v1397_v63 = vld [vmem:[#allocation3 + $0xfc] ss:$24 sps:$4 sm:$0xff]   ;;  %v1405_v7 = vld [vmem:[#allocation3 + $0xa0] ss:$24 sps:$4 sm:$0xff]   ;;  %v1408_v9 = vld [vmem:[#allocation3 + $0x70] ss:$24 sps:$4 sm:$0xff]  }
  0x37   : > { %1226 = vmatprep.subr.bf16.mxu0 %v1484_v1  ;;  %1246 = vmatprep.subr.bf16.mxu1 %v1484_v1  ;;  %v1411_v11 = vld [vmem:[#allocation3 + $0x40] ss:$24 sps:$4 sm:$0xff]   ;;  %v1416_v46 = vld [vmem:[#allocation3 + $0x134] ss:$24 sps:$4 sm:$0xff]   ;;  %v1421_v50 = vld [vmem:[#allocation3 + $0x44] ss:$24 sps:$4 sm:$0xff]  }
  0x3a   : > { %1227 = vmatpush3.bf16.msra.mxu0 %v1363_v8  ;;  %1247 = vmatpush3.bf16.msra.mxu1 %v1371_v13  ;;  %v1403_v8 = vld [vmem:[#allocation3 + $0x9c] ss:$24 sps:$4 sm:$0xff]   ;;  %v1414_v13 = vld [vmem:[#allocation3 + $0x10] ss:$24 sps:$4 sm:$0xff]  }
  0x3b   : > { %1228 = vmatprep.subr.bf16.mxu0 %v1484_v1  ;;  %1248 = vmatprep.subr.bf16.mxu1 %v1484_v1 }
  0x3e   : > { %1229 = vmatpush3.bf16.msra.mxu0 %v1364_v10  ;;  %1249 = vmatpush3.bf16.msra.mxu1 %v1372_v15  ;;  %v1406_v10 = vld [vmem:[#allocation3 + $0x6c] ss:$24 sps:$4 sm:$0xff]   ;;  %v1486_v15 = vmov 0  }
  0x3f   : > { %1230 = vmatprep.subr.bf16.mxu0 %v1484_v1  ;;  %1250 = vmatprep.subr.bf16.mxu1 %v1484_v1 }
  0x42   : > { %1231 = vmatpush3.bf16.msra.mxu0 %v1365_v12  ;;  %1251 = vmatpush3.bf16.msra.mxu1 %v1373_v17  ;;  %v1409_v12 = vld [vmem:[#allocation3 + $0x3c] ss:$24 sps:$4 sm:$0xff]  }
  0x43   : > { %1232 = vmatprep.subr.bf16.mxu0 %v1484_v1  ;;  %1252 = vmatprep.subr.bf16.mxu1 %v1484_v1 }
  0x46   : > { %1233 = vmatpush3.bf16.msra.mxu0 %v1366_v14  ;;  %1253 = vmatpush3.bf16.msra.mxu1 %v1374_v18  ;;  %v1412_v14 = vld [vmem:[#allocation3 + $0xc] ss:$24 sps:$4 sm:$0xff]  }
  0x47   : > { %1258 = vmatprep.subr.bf16.mxu0 %v1484_v1  ;;  %1278 = vmatprep.subr.bf16.mxu1 %v1484_v1 }
  0x49   : > { %1235 = vmatmul.mubr.bf16.vlgmr.msra.gmra.mxu0 %v268_v16  ;;  %v508_v16 = vsub.s32 2, %v1602_v26 }
  0x4a   : > { %1274 = vmatprep.mubr.msk.bf16.mxu0 %vm1485_vm0, %v1484_v1  ;;  %1259 = vmatpush3.bf16.msra.mxu0 %v1376_v19 }
  0x4b   : > { %1260 = vmatprep.subr.bf16.mxu0 %v1484_v1  ;;  %v509_v17 = vrot.slane %v1608_v28, %v508_v16 }
  0x4e   : > { %1261 = vmatpush3.bf16.msra.mxu0 %v1378_v20 }
  0x4f   : > { %1262 = vmatprep.subr.bf16.mxu0 %v1484_v1 }
  0x52   : > { %1263 = vmatpush3.bf16.msra.mxu0 %v1380_v21 }
  0x53   : > { %1264 = vmatprep.subr.bf16.mxu0 %v1484_v1 }
  0x56   : > { %1265 = vmatpush3.bf16.msra.mxu0 %v1382_v22 }
  0x57   : > { %1266 = vmatprep.subr.bf16.mxu0 %v1484_v1 }
  0x5a   : > { %1267 = vmatpush3.bf16.msra.mxu0 %v1384_v23 }
  0x5b   : > { %1268 = vmatprep.subr.bf16.mxu0 %v1484_v1 }
  0x5e   : > { %1269 = vmatpush3.bf16.msra.mxu0 %v1386_v24 }
  0x5f   : > { %1270 = vmatprep.subr.bf16.mxu0 %v1484_v1 }
  0x62   : > { %1271 = vmatpush3.bf16.msra.mxu0 %v1388_v44 }
  0x63   : > { %1272 = vmatprep.subr.bf16.mxu0 %v1484_v1 }
  0x66   : > { %1273 = vmatpush3.bf16.msra.mxu0 %v1390_v48  ;;  %v1419_v48 = vld [vmem:[#allocation3 + $0xa4] ss:$24 sps:$4 sm:$0xff]  }
  0x67   : > { %802 = vmatprep.subr.bf16.mxu0 %v1393_v49  ;;  %v1420_v49 = vld [vmem:[#allocation3 + $0x74] ss:$24 sps:$4 sm:$0xff]  }
 0x109   : > { %v372_v30 = vpop.f32.mrf.mxu0 }
 0x10a   : > { %v373_v31 = vadd.f32 %v372_v30, %v289_v29  ;;  %v845_v29 = vsub.s32 4, %v1602_v26 }
 0x10b   : > { %v1236_v32 = vpop.f32.mrf.mxu0 }
 0x10c   : > { %v378_v33 = vmax.f32 %v373_v31, 0.0  ;;  %v846_v30 = vrot.slane %v1608_v28, %v845_v29 }
 0x10d   : > { %v375_v34 = vpop.f32.mrf.mxu0 }
 0x10e   : > { %v379_v36 = vpack.c.bf16 %v378_v33, %v378_v33 }
 0x10f   : > { %v1237_v37 = vpop.f32.mrf.mxu0 }
 0x110   : > { %1255 = vmatmul.mubr.bf16.vlgmr.msra.gmra.mxu1 %v379_v36  ;;  %v849_v36 = vand.u32 127, %v286_v25  ;;  %v1417_v25 = vld [vmem:[#allocation3 + $0x104] ss:$24 sps:$4 sm:$0xff]  }
 0x111   : > { %1279 = vmatpush3.bf16.msra.mxu1 %v1375_v35  ;;  %1294 = vmatprep.mubr.msk.bf16.mxu1 %vm1485_vm0, %v1484_v1 }
 0x112   : > { %1280 = vmatprep.subr.bf16.mxu1 %v1484_v1 }
 0x115   : > { %1281 = vmatpush3.bf16.msra.mxu1 %v1377_v38 }
 0x116   : > { %1282 = vmatprep.subr.bf16.mxu1 %v1484_v1 }
 0x119   : > { %1283 = vmatpush3.bf16.msra.mxu1 %v1379_v39 }
 0x11a   : > { %1284 = vmatprep.subr.bf16.mxu1 %v1484_v1 }
 0x11d   : > { %1285 = vmatpush3.bf16.msra.mxu1 %v1381_v40 }
 0x11e   : > { %1286 = vmatprep.subr.bf16.mxu1 %v1484_v1 }
 0x121   : > { %1287 = vmatpush3.bf16.msra.mxu1 %v1383_v41  ;;  %v1415_v41 = vld [vmem:[#allocation3 + $0x164] ss:$24 sps:$4 sm:$0xff]  }
 0x122   : > { %1288 = vmatprep.subr.bf16.mxu1 %v1484_v1 }
 0x125   : > { %1289 = vmatpush3.bf16.msra.mxu1 %v1385_v42 }
 0x126   : > { %1290 = vmatprep.subr.bf16.mxu1 %v1484_v1 }
 0x129   : > { %1291 = vmatpush3.bf16.msra.mxu1 %v1387_v43 }
 0x12a   : > { %1292 = vmatprep.subr.bf16.mxu1 %v1484_v1 }
 0x12d   : > { %1293 = vmatpush3.bf16.msra.mxu1 %v1389_v45 }
 0x12e   : > { %1298 = vmatprep.subr.bf16.mxu1 %v1484_v1 }
 0x130   : > { %1295 = vmatmul.mubr.bf16.vlgmr.msra.gmra.mxu1 %v598_v47  ;;  %v1418_v47 = vld [vmem:[#allocation3 + $0xd4] ss:$24 sps:$4 sm:$0xff]  }
 0x131   : > { %1314 = vmatprep.mubr.msk.bf16.mxu1 %vm1485_vm0, %v1484_v1  ;;  %1299 = vmatpush3.bf16.msra.mxu1 %v1415_v41 }
 0x132   : > { %1300 = vmatprep.subr.bf16.mxu1 %v1484_v1 }
 0x135   : > { %1301 = vmatpush3.bf16.msra.mxu1 %v1416_v46 }
 0x136   : > { %1302 = vmatprep.subr.bf16.mxu1 %v1484_v1 }
 0x139   : > { %1303 = vmatpush3.bf16.msra.mxu1 %v1417_v25 }
 0x13a   : > { %1304 = vmatprep.subr.bf16.mxu1 %v1484_v1 }
 0x13d   : > { %1305 = vmatpush3.bf16.msra.mxu1 %v1418_v47 }
 0x13e   : > { %1306 = vmatprep.subr.bf16.mxu1 %v1484_v1 }
 0x141   : > { %1307 = vmatpush3.bf16.msra.mxu1 %v1419_v48 }
 0x142   : > { %1308 = vmatprep.subr.bf16.mxu1 %v1484_v1 }
 0x145   : > { %1309 = vmatpush3.bf16.msra.mxu1 %v1420_v49 }
 0x146   : > { %1310 = vmatprep.subr.bf16.mxu1 %v1484_v1 }
 0x149   : > { %1311 = vmatpush3.bf16.msra.mxu1 %v1421_v50 }
 0x14a   : > { %1312 = vmatprep.subr.bf16.mxu1 %v1484_v1 }
 0x1d0   : > { %v482_v52 = vpop.f32.mrf.mxu1 }
 0x1d1   : > { %v483_v53 = vadd.f32 %v482_v52, %v399_v51  ;;  %v1422_v51 = vld [vmem:[#allocation3 + $0x14] ss:$24 sps:$4 sm:$0xff]  }
 0x1d2   : > { %v1256_v54 = vpop.f32.mrf.mxu1  ;;  %1313 = vmatpush3.bf16.msra.mxu1 %v1422_v51 }
 0x1d3   : > { %v488_v55 = vmax.f32 %v483_v53, 0.0  ;;  %v871_v53 = vsub.s32 3, %v1602_v26 }
 0x1d4   : > { %v485_v56 = vpop.f32.mrf.mxu1 }
 0x1d5   : > { %v489_v58 = vpack.c.bf16 %v488_v55, %v488_v55 }
 0x1d6   : > { %v1257_v60 = vpop.f32.mrf.mxu1 }
 0x1d7   : > { %1275 = vmatmul.mubr.bf16.vlgmr.msra.gmra.mxu0 %v489_v58 }
 0x1d8   : > { %803 = vmatpush1.bf16.msra.mxu0 %v1391_v57  ;;  %834 = vmatprep.mubr.bf16.mxu0 %v1486_v15  ;;  %v872_v57 = vrot.slane %v1608_v28, %v871_v53 }
 0x1d9   : > { %804 = vmatprep.subr.bf16.mxu0 %v1396_v59 }
 0x1dc   : > { %805 = vmatpush1.bf16.msra.mxu0 %v1394_v61 }
 0x1dd   : > { %806 = vmatprep.subr.bf16.mxu0 %v1399_v62 }
 0x1e0   : > { %807 = vmatpush1.bf16.msra.mxu0 %v1397_v63 }
 0x1e1   : > { %808 = vmatprep.subr.bf16.mxu0 %v1402_v3 }
 0x1e4   : > { %809 = vmatpush1.bf16.msra.mxu0 %v1400_v5 }
 0x1e5   : > { %810 = vmatprep.subr.bf16.mxu0 %v1405_v7 }
 0x1e8   : > { %811 = vmatpush1.bf16.msra.mxu0 %v1403_v8 }
 0x1e9   : > { %812 = vmatprep.subr.bf16.mxu0 %v1408_v9 }
 0x1ec   : > { %813 = vmatpush1.bf16.msra.mxu0 %v1406_v10 }
 0x1ed   : > { %814 = vmatprep.subr.bf16.mxu0 %v1411_v11 }
 0x1f0   : > { %v697_v0 = vpop.f32.mrf.mxu1  ;;  %815 = vmatpush1.bf16.msra.mxu0 %v1409_v12 }
 0x1f1   : > { %816 = vmatprep.subr.bf16.mxu0 %v1414_v13 }
 0x1f2   : > { %v1296_v2 = vpop.f32.mrf.mxu1 }
 0x1f4   : > { %v700_v4 = vpop.f32.mrf.mxu1  ;;  %817 = vmatpush1.bf16.msra.mxu0 %v1412_v14 }
 0x1f6   : > { %v1297_v6 = vpop.f32.mrf.mxu1 }
 0x297   : > { %v592_v18 = vpop.f32.mrf.mxu0 }
 0x298   : > { %v1628_v19 = vadd.f32 %v592_v18, %v509_v17 }
 0x299   : > { %v1276_v20 = vpop.f32.mrf.mxu0 }
 0x29a   : > { %v703_v21 = vadd.f32 %v697_v0, %v1628_v19  ;;  %v896_v0 = vsub.s32 5, %v1602_v26 }
 0x29b   : > { %v595_v22 = vpop.f32.mrf.mxu0 }
 0x29c   : > { %1423 = vtanh.f32 %v703_v21  ;;  %v897_v2 = vrot.slane %v1608_v28, %v896_v0 }
 0x29d   : > { %v1277_v23 = vpop.f32.mrf.mxu0 }
 0x2a9   : > { %v1424_v24 = vpop.eup %1423 }
 0x2aa   : > { %v705_v27 = vpack.c.bf16 %v1424_v24, %v1424_v24 }
 0x2ac   : > { %835 = vmatmul.mubr.bf16.vlgmr.msra.gmra.mxu0 %v705_v27 }
 0x36c   : > { %v836_v31 = vpop.f32.mrf.mxu0 }
 0x36e   : > { %v838_v32 = vpop.f32.mrf.mxu0 }
 0x36f   : > { %v847_v33 = vadd.f32 %v846_v30, %v838_v32 }
 0x370   : > { %v840_v34 = vpop.f32.mrf.mxu0 }
 0x371   : > { %987 = vst [vmem:[%s1564_s11] sm:$0xff] %v847_v33  ;;  %850 = vmax.xlane.f32.xlu0 %v847_v33 }
 0x372   : > { %v841_v35 = vpop.f32.mrf.mxu0 }
 0x3fa   : > { %v851_v37 = vpop.xlane.xlu0 %850 }
 0x3fb   : > { %vm852_vm1 = vcmp.eq.f32.partialorder %v847_v33, %v851_v37 }
 0x3fc   : > { %v853_v38 = vsel %vm852_vm1, %v849_v36, 128 }
 0x3fd   : > { %v855_v39 = vshra.s32 %v853_v38, 16  ;;  %v854_v42 = vand.u32 65535, %v853_v38 }
 0x3ff   : > { %v857_v40 = vcvt.s32.f32 %v855_v39  ;;  %v856_v44 = vcvt.s32.f32 %v854_v42 }
 0x401   : > { %858 = vmin.xlane.f32.xlu0 %v857_v40 }
 0x48a   : > { %v859_v43 = vpop.xlane.xlu0 %858 }
 0x48b   : > { %vm860_vm2 = vcmp.eq.f32.partialorder %v857_v40, %v859_v43  ;;  %v865_v52 = vcvt.f32.s32 %v859_v43 }
 0x48c   : > { %v861_v45 = vsel %vm860_vm2, %v856_v44, inf }
 0x48d   : > { %862 = vmin.xlane.f32.xlu1 %v861_v45  ;;  %v866_v55 = vshll.u32 %v865_v52, 16 }
 0x516   : > { %v863_v54 = vpop.xlane.xlu1 %862 }
 0x517   : > { %v864_v56 = vcvt.f32.s32 %v863_v54 }
 0x519   : > { %v867_v58 = vadd.s32 %v866_v55, %v864_v56 }
 0x51b   : > { %v868_v59 = vcvt.s32.f32 %v867_v58 }
 0x51d   : > { %v873_v60 = vmul.f32 %v872_v57, %v868_v59 }
 0x51f   : > { %v874_v61 = vadd.f32 %v873_v60, %v1628_v19 }
 0x521   : > { %v875_v62 = vadd.f32 %v874_v61, %v836_v31 }
 0x523   : > { %1425 = vtanh.f32 %v875_v62 }
 0x530   : > { %v1426_v1 = vpop.eup %1425 }
 0x531   : > { %986 = vst [vmem:[#allocation2] sm:$0xff] %v1426_v1  ;;  %989 = vst [vmem:[%s1564_s11 + $0x10] sm:$0xff] %v1426_v1  ;;  %v877_v63 = vpack.c.bf16 %v1426_v1, %v1426_v1 }
 0x533   : > { %1315 = vmatmul.mubr.bf16.vlgmr.msra.gmra.mxu1 %v877_v63 }
 0x5f3   : > { %v980_v3 = vpop.f32.mrf.mxu1 }
 0x5f4   : > { %v981_v4 = vadd.f32 %v980_v3, %v897_v2 }
 0x5f5   : > { %v1316_v5 = vpop.f32.mrf.mxu1 }
 0x5f6   : > { %988 = vst [vmem:[%s1564_s11 + $0x8] sm:$0xff] %v981_v4 }
 0x5f7   : > { %v983_v6 = vpop.f32.mrf.mxu1 }
 0x5f9   : > { %v1317_v7 = vpop.f32.mrf.mxu1 }
 0x5fa PF: > { %s15_s17 = sadd.s32 1, %s1479_s17   ;;  %s1665_s15 = smov %s1475_s16 }
 0x5fb   : > { %p12_p3 = scmp.ge.s32.totalorder %s15_s17, 10   ;;  %s1666_s16 = smov %s1668_s19 }
 0x5fd   :  { %14 = sbr.rel (!%p12_p3) target bundleno = 2 (0x2), region = 78 }
 0x602   :  { %1019 = vsyncpa [#allocation4], 1 }
 0x603   :  { %1021 = vsyncpa [#allocation4 + $0x1], 1 }

</bundles_post_ra>
